<compile_context>
chip_gen: v7x
topology: tpu7x:2x2x1
jax: 0.10.0
libtpu: 0.0.40
codegen_flags: <defaults>
</compile_context>

<pallas_src>
import math

import jax
import jax.numpy as jnp
from jax import lax
from jax.experimental import pallas as pl
from jax.experimental.pallas import tpu as pltpu

# Valid on v7x's 64 MiB VMEM as well as v5e/v6e's 128 MiB.
_VMEM_LIMIT_BYTES = 32 * 1024 * 1024
# Per-tile budget for the streamed (double-buffered) operands of a grid step.
_TILE_BYTES_BUDGET = 12 * 1024 * 1024


def _round_up(x, m):
    return ((x + m - 1) // m) * m


def _compiler_params(dimension_semantics):
    return pltpu.CompilerParams(
        dimension_semantics=dimension_semantics,
        vmem_limit_bytes=_VMEM_LIMIT_BYTES,
    )


def _pick_m_tile(m, row_bytes):
    """Largest row tile (multiple of 8, <=512) whose streamed operands fit the
    per-tile VMEM budget.  M is padded up to a multiple of the tile."""
    m8 = _round_up(max(m, 1), 8)
    tile = 8
    for cand in (16, 32, 64, 128, 256, 512):
        if cand > m8:
            break
        if cand * row_bytes <= _TILE_BYTES_BUDGET:
            tile = cand
    return min(tile, m8)


def _pick_time_chunk(seq, batch, hidden3):
    """Timesteps per grid step: amortize ~0.35us/step overhead, VMEM-aware."""
    hidden = hidden3 // 3
    t = 16
    # gates chunk (bf16, double-buffered) + out chunk (bf16, double-buffered)
    while t > 1 and (t > seq or
                     2 * t * batch * (hidden3 + hidden) * 2 > _TILE_BYTES_BUDGET):
        t //= 2
    return t


# ----------------------------------------------------------------------------
# Single-buffering of grid-invariant operands (weights/biases).
# Probed once WITH a numerical check; any failure -> default double buffering.
# ----------------------------------------------------------------------------
_SINGLE_BUFFER_OK = None


def _supports_single_buffering():
    global _SINGLE_BUFFER_OK
    if _SINGLE_BUFFER_OK is None:
        try:
            def _copy_kernel(x_ref, o_ref):
                o_ref[...] = x_ref[...]

            x = jnp.arange(8 * 128, dtype=jnp.float32).reshape(8, 128)
            probe = pl.pallas_call(
                _copy_kernel,
                out_shape=jax.ShapeDtypeStruct((16, 128), jnp.float32),
                grid=(2,),
                in_specs=[pl.BlockSpec((8, 128), lambda i: (0, 0),
                                       pipeline_mode=pl.Buffered(1))],
                out_specs=pl.BlockSpec((8, 128), lambda i: (i, 0)),
            )(x)
            probe = jax.block_until_ready(probe)
            _SINGLE_BUFFER_OK = bool(jnp.allclose(probe[:8], x)
                                     and jnp.allclose(probe[8:], x))
        except Exception:  # noqa: BLE001 - any failure -> safe fallback
            _SINGLE_BUFFER_OK = False
    return _SINGLE_BUFFER_OK


def invariant_spec(block_shape, index_map):
    """BlockSpec for operands whose block never changes across the grid."""
    if _supports_single_buffering():
        return pl.BlockSpec(block_shape, index_map, pipeline_mode=pl.Buffered(1))
    return pl.BlockSpec(block_shape, index_map)


# ----------------------------------------------------------------------------
# Kernel 1: fused input projection for all timesteps of one layer.
#   gi = x @ W_i(In, 3H) + b_i   (b_i already holds b_ir+b_hr | b_iz+b_hz | b_in)
# ----------------------------------------------------------------------------
def gate_projection_kernel(x_ref, w_ref, b_ref, g_ref):
    x = x_ref[...].astype(jnp.bfloat16)            # bf16 MXU operand
    g = jnp.dot(x, w_ref[...], preferred_element_type=jnp.float32) + b_ref[...]
    g_ref[...] = g.astype(g_ref.dtype)             # bf16 out -> half HBM traffic


def gru_gate_projection(x, layer):
    """x: (S, B, In) -> gate pre-activations (S, B, 3H) in bf16."""
    seq, batch, in_size = x.shape
    hidden3 = layer["w_ih_t"].shape[1]
    m = seq * batch
    x2d = x.reshape(m, in_size)

    row_bytes = 2 * in_size * x2d.dtype.itemsize + 2 * hidden3 * 2
    tm = _pick_m_tile(m, row_bytes)
    m_pad = _round_up(m, tm)
    if m_pad != m:
        x2d = jnp.pad(x2d, ((0, m_pad - m), (0, 0)))

    gates = pl.pallas_call(
        gate_projection_kernel,
        out_shape=jax.ShapeDtypeStruct((m_pad, hidden3), jnp.bfloat16),
        grid_spec=pltpu.PrefetchScalarGridSpec(
            num_scalar_prefetch=0,
            grid=(m_pad // tm,),
            in_specs=[
                pl.BlockSpec((tm, in_size), lambda i: (i, 0)),
                invariant_spec((in_size, hidden3), lambda i: (0, 0)),
                invariant_spec((1, hidden3), lambda i: (0, 0)),
            ],
            out_specs=pl.BlockSpec((tm, hidden3), lambda i: (i, 0)),
        ),
        compiler_params=_compiler_params(("parallel",)),
    )(x2d, layer["w_ih_t"], layer["b_i"])

    if m_pad != m:
        gates = gates[:m]
    return gates.reshape(seq, batch, hidden3)


# ----------------------------------------------------------------------------
# Kernel 2: the recurrence.  One grid step per chunk of T timesteps; hidden
# state carried across grid steps in an f32 VMEM scratch; ONE fused hidden
# matmul per timestep.
# ----------------------------------------------------------------------------
def gru_recurrent_kernel(g_ref, whh_ref, bhn_ref, out_ref, h_scratch):
    # g_ref:   (T, B, 3H) bf16 fused input-gate pre-activations
    # whh_ref: (H, 3H) bf16    bhn_ref: (1, H) f32
    # out_ref: (T, B, H) bf16  h_scratch: (B, H) f32 carried hidden state
    @pl.when(pl.program_id(0) == 0)
    def _():
        h_scratch[...] = jnp.zeros_like(h_scratch)   # h_0 = zeros (PyTorch forward)

    t_chunk = g_ref.shape[0]
    hidden = h_scratch.shape[1]

    # Hoist grid-invariant loads out of the (unrolled) timestep loop.
    whh = whh_ref[...]
    bhn = bhn_ref[...].astype(jnp.float32)

    def step(tt, h):
        hb = h.astype(jnp.bfloat16)                  # bf16 MXU operand, f32 acc
        gh = jnp.dot(hb, whh, preferred_element_type=jnp.float32)   # (B, 3H)
        gi = g_ref[tt].astype(jnp.float32)                          # (B, 3H)
        # Gate math stays f32 (v5e VPU/EUP have no bf16 path).
        r = jax.nn.sigmoid(gi[:, 0:hidden] + gh[:, 0:hidden])
        z = jax.nn.sigmoid(gi[:, hidden:2 * hidden] + gh[:, hidden:2 * hidden])
        n = jnp.tanh(gi[:, 2 * hidden:] + r * (gh[:, 2 * hidden:] + bhn))
        h_new = (1.0 - z) * n + z * h
        out_ref[tt] = h_new.astype(out_ref.dtype)
        return h_new

    unroll = t_chunk if t_chunk <= 8 else 8          # partial unroll for big chunks
    h_scratch[...] = lax.fori_loop(0, t_chunk, step, h_scratch[...], unroll=unroll)


def gru_recurrence(gates, layer):
    seq, batch, hidden3 = gates.shape
    hidden = hidden3 // 3
    t_chunk = _pick_time_chunk(seq, batch, hidden3)
    seq_pad = _round_up(seq, t_chunk)
    if seq_pad != seq:
        # Trailing zero-padded timesteps only write rows we slice off below.
        gates = jnp.pad(gates, ((0, seq_pad - seq), (0, 0), (0, 0)))

    out = pl.pallas_call(
        gru_recurrent_kernel,
        out_shape=jax.ShapeDtypeStruct((seq_pad, batch, hidden), jnp.bfloat16),
        grid_spec=pltpu.PrefetchScalarGridSpec(
            num_scalar_prefetch=0,
            grid=(seq_pad // t_chunk,),
            in_specs=[
                pl.BlockSpec((t_chunk, batch, hidden3), lambda c: (c, 0, 0)),
                invariant_spec((hidden, hidden3), lambda c: (0, 0)),
                invariant_spec((1, hidden), lambda c: (0, 0)),
            ],
            out_specs=pl.BlockSpec((t_chunk, batch, hidden), lambda c: (c, 0, 0)),
            scratch_shapes=[pltpu.VMEM((batch, hidden), jnp.float32)],
        ),
        compiler_params=_compiler_params(("arbitrary",)),  # time recurrence
    )(gates, layer["w_hh_t"], layer["b_hn"])

    if seq_pad != seq:
        out = out[:seq]
    return out


# ----------------------------------------------------------------------------
# Kernel 3: MLP head, fused relu -> fc1 -> relu -> fc2, tiled over M rows.
# ----------------------------------------------------------------------------
def mlp_head_kernel(x_ref, w1_ref, b1_ref, w2_ref, b2_ref, out_ref):
    x = jnp.maximum(x_ref[...], 0).astype(jnp.bfloat16)         # relu(gru out)
    h = jnp.dot(x, w1_ref[...], preferred_element_type=jnp.float32) + b1_ref[...]
    h = jnp.maximum(h, 0.0).astype(jnp.bfloat16)                 # relu
    y = jnp.dot(h, w2_ref[...], preferred_element_type=jnp.float32) + b2_ref[...]
    out_ref[...] = y.astype(out_ref.dtype)


def mlp_head(x2d, params):
    m, hidden = x2d.shape
    fc1_out = params["fc1_w_t"].shape[1]
    num_classes = params["fc2_w_t"].shape[1]

    row_bytes = (2 * hidden * x2d.dtype.itemsize + fc1_out * 4
                 + 2 * num_classes * 4)
    tm = _pick_m_tile(m, row_bytes)
    m_pad = _round_up(m, tm)
    if m_pad != m:
        x2d = jnp.pad(x2d, ((0, m_pad - m), (0, 0)))

    y = pl.pallas_call(
        mlp_head_kernel,
        out_shape=jax.ShapeDtypeStruct((m_pad, num_classes), jnp.float32),
        grid_spec=pltpu.PrefetchScalarGridSpec(
            num_scalar_prefetch=0,
            grid=(m_pad // tm,),
            in_specs=[
                pl.BlockSpec((tm, hidden), lambda i: (i, 0)),
                invariant_spec((hidden, fc1_out), lambda i: (0, 0)),
                invariant_spec((1, fc1_out), lambda i: (0, 0)),
                invariant_spec((fc1_out, num_classes), lambda i: (0, 0)),
                invariant_spec((1, num_classes), lambda i: (0, 0)),
            ],
            out_specs=pl.BlockSpec((tm, num_classes), lambda i: (i, 0)),
        ),
        compiler_params=_compiler_params(("parallel",)),
    )(x2d, params["fc1_w_t"], params["fc1_b"],
      params["fc2_w_t"], params["fc2_b"])

    if m_pad != m:
        y = y[:m]
    return y


# ----------------------------------------------------------------------------
# Full model: stacked GRU layers (h_0 = zeros) + relu/fc1/relu/fc2 head.
# ----------------------------------------------------------------------------
def gru_model_forward(x, params):
    out = x
    for layer in params["gru_layers"]:
        gates = gru_gate_projection(out, layer)   # hoisted, fused input projection
        out = gru_recurrence(gates, layer)        # time recurrence only
    seq, batch, hidden = out.shape
    # TODO(synk): fuse the head into the last layer's recurrent kernel to skip
    # one HBM round-trip of the (S,B,H) activations.
    y2d = mlp_head(out.reshape(seq * batch, hidden), params)
    return y2d.reshape(seq, batch, -1)


def init_params(key, input_size, hidden_size, num_layers, fc1_out, num_classes):
    """PyTorch-style uniform(-1/sqrt(H), 1/sqrt(H)) init.  Weights are packed
    gate-fused (r|z|n), pre-transposed, bf16; biases f32.  b_hr/b_hz are folded
    into the input-projection bias; b_hn stays separate (it is multiplied by r)."""
    params = {"gru_layers": []}
    H = hidden_size
    k = 1.0 / math.sqrt(H)
    keys = jax.random.split(key, num_layers * 4 + 4)
    ki = 0
    for layer in range(num_layers):
        in_sz = input_size if layer == 0 else hidden_size
        w_ih = jax.random.uniform(keys[ki], (3 * H, in_sz),
                                  minval=-k, maxval=k, dtype=jnp.float32); ki += 1
        w_hh = jax.random.uniform(keys[ki], (3 * H, H),
                                  minval=-k, maxval=k, dtype=jnp.float32); ki += 1
        b_ih = jax.random.uniform(keys[ki], (3 * H,),
                                  minval=-k, maxval=k, dtype=jnp.float32); ki += 1
        b_hh = jax.random.uniform(keys[ki], (3 * H,),
                                  minval=-k, maxval=k, dtype=jnp.float32); ki += 1
        b_i = jnp.concatenate([b_ih[0:2 * H] + b_hh[0:2 * H], b_ih[2 * H:]])
        params["gru_layers"].append({
            "w_ih_t": w_ih.T.astype(jnp.bfloat16),     # (in, 3H), gate order r|z|n
            "w_hh_t": w_hh.T.astype(jnp.bfloat16),     # (H, 3H)
            "b_i": b_i.reshape(1, 3 * H),              # f32, b_hr/b_hz folded in
            "b_hn": b_hh[2 * H:].reshape(1, H),        # f32, stays in recurrence
        })

    k1 = 1.0 / math.sqrt(hidden_size)
    fc1_w = jax.random.uniform(keys[ki], (fc1_out, hidden_size),
                               minval=-k1, maxval=k1, dtype=jnp.float32); ki += 1
    fc1_b = jax.random.uniform(keys[ki], (fc1_out,),
                               minval=-k1, maxval=k1, dtype=jnp.float32); ki += 1
    k2 = 1.0 / math.sqrt(fc1_out)
    fc2_w = jax.random.uniform(keys[ki], (num_classes, fc1_out),
                               minval=-k2, maxval=k2, dtype=jnp.float32); ki += 1
    fc2_b = jax.random.uniform(keys[ki], (num_classes,),
                               minval=-k2, maxval=k2, dtype=jnp.float32); ki += 1
    params["fc1_w_t"] = fc1_w.T.astype(jnp.bfloat16)
    params["fc1_b"] = fc1_b.reshape(1, fc1_out)
    params["fc2_w_t"] = fc2_w.T.astype(jnp.bfloat16)
    params["fc2_b"] = fc2_b.reshape(1, num_classes)
    return params


if __name__ == "__main__":
    # Small deterministic configuration (time-major input).
    # NOTE: numerics differ slightly from f32 PyTorch nn.GRU (bf16 MXU operands
    # and bf16-stored gate pre-activations / layer outputs); gate math and the
    # carried hidden state are f32.
    seq_len, batch = 16, 2
    input_size, hidden_size, num_layers = 16, 32, 2
    fc1_out, num_classes = 64, 10

    key = jax.random.PRNGKey(0)
    k_x, k_p = jax.random.split(key)
    x = jax.random.normal(k_x, (seq_len, batch, input_size), dtype=jnp.float32)
    params = init_params(k_p, input_size, hidden_size, num_layers,
                         fc1_out, num_classes)

    out = gru_model_forward(x, params)
    jax.block_until_ready(out)
    assert out.shape == (seq_len, batch, num_classes)
    assert bool(jnp.all(jnp.isfinite(out)))
    print("KERNEL_OK")
</pallas_src>

<mosaic_0001>
module attributes {stable_mosaic.version = 11 : i64} {
  func.func @_copy_kernel(%arg0: i32, %arg1: memref<8x128xf32, #tpu.memory_space<vmem>>, %arg2: memref<8x128xf32, #tpu.memory_space<vmem>>) attributes {dimension_semantics = [#tpu.dimension_semantics<arbitrary>], iteration_bounds = array<i64: 2>, scalar_prefetch = 0 : i64, scratch_operands = 0 : i64, tpu.core_type = #tpu.core_type<tc>, window_params = [{pipeline_mode = #tpu.pipeline_mode<synchronous>, transform_indices = @transform_0, window_bounds = array<i64: 8, 128>}, {transform_indices = @transform_1, window_bounds = array<i64: 8, 128>}]} {
    %c0 = arith.constant 0 : index
    %c0_0 = arith.constant 0 : index
    %0 = vector.load %arg1[%c0, %c0_0] : memref<8x128xf32, #tpu.memory_space<vmem>>, vector<8x128xf32>
    %c0_1 = arith.constant 0 : index
    %c0_2 = arith.constant 0 : index
    %1 = vector.load %arg2[%c0_1, %c0_2] : memref<8x128xf32, #tpu.memory_space<vmem>>, vector<8x128xf32>
    tpu.vector_store %arg2[%c0_1, %c0_2], %0 {strides = array<i32>} : memref<8x128xf32, #tpu.memory_space<vmem>>, vector<8x128xf32>,
    return
  }
  func.func @transform_0(%arg0: i32) -> (i32, i32) {
    %c0_i32 = arith.constant 0 : i32
    %c0_i32_0 = arith.constant 0 : i32
    %c0_i32_1 = arith.constant 0 : i32
    return %c0_i32, %c0_i32_0 : i32, i32
  }
  func.func @transform_1(%arg0: i32) -> (i32, i32) {
    %c0_i32 = arith.constant 0 : i32
    %c0_i32_0 = arith.constant 0 : i32
    return %arg0, %c0_i32 : i32, i32
  }
}

module attributes {stable_mosaic.version = 11 : i64} {
  func.func @gate_projection_kernel(%arg0: i32, %arg1: memref<32x16xf32, #tpu.memory_space<vmem>>, %arg2: memref<16x96xbf16, #tpu.memory_space<vmem>>, %arg3: memref<1x96xf32, #tpu.memory_space<vmem>>, %arg4: memref<32x96xbf16, #tpu.memory_space<vmem>>) attributes {dimension_semantics = [#tpu.dimension_semantics<parallel>], iteration_bounds = array<i64: 1>, scalar_prefetch = 0 : i64, scratch_operands = 0 : i64, tpu.core_type = #tpu.core_type<tc>, window_params = [{transform_indices = @transform_0, window_bounds = array<i64: 32, 16>}, {pipeline_mode = #tpu.pipeline_mode<synchronous>, transform_indices = @transform_1, window_bounds = array<i64: 16, 96>}, {pipeline_mode = #tpu.pipeline_mode<synchronous>, transform_indices = @transform_2, window_bounds = array<i64: 1, 96>}, {transform_indices = @transform_3, window_bounds = array<i64: 32, 96>}]} {
    %c0 = arith.constant 0 : index
    %c0_0 = arith.constant 0 : index
    %0 = vector.load %arg1[%c0, %c0_0] : memref<32x16xf32, #tpu.memory_space<vmem>>, vector<32x16xf32>
    %1 = arith.truncf %0 : vector<32x16xf32> to vector<32x16xbf16>
    %c0_1 = arith.constant 0 : index
    %c0_2 = arith.constant 0 : index
    %2 = vector.load %arg2[%c0_1, %c0_2] : memref<16x96xbf16, #tpu.memory_space<vmem>>, vector<16x96xbf16>
    %cst = arith.constant dense<0.000000e+00> : vector<32x96xf32>
    %3 = tpu.matmul %1, %2, %cst {dimension_numbers = #tpu.dot_dimension_numbers<[1], [0], [0], [1], [0, 0, 1, 1], [], []>} : vector<32x16xbf16>, vector<16x96xbf16>, vector<32x96xf32> -> vector<32x96xf32>
    %c0_3 = arith.constant 0 : index
    %c0_4 = arith.constant 0 : index
    %4 = vector.load %arg3[%c0_3, %c0_4] : memref<1x96xf32, #tpu.memory_space<vmem>>, vector<1x96xf32>
    %5 = vector.broadcast %4 : vector<1x96xf32> to vector<32x96xf32>
    %6 = arith.addf %3, %5 : vector<32x96xf32>
    %7 = arith.truncf %6 : vector<32x96xf32> to vector<32x96xbf16>
    %c0_5 = arith.constant 0 : index
    %c0_6 = arith.constant 0 : index
    %8 = vector.load %arg4[%c0_5, %c0_6] : memref<32x96xbf16, #tpu.memory_space<vmem>>, vector<32x96xbf16>
    tpu.vector_store %arg4[%c0_5, %c0_6], %7 {strides = array<i32>} : memref<32x96xbf16, #tpu.memory_space<vmem>>, vector<32x96xbf16>,
    return
  }
  func.func @transform_0(%arg0: i32) -> (i32, i32) {
    %c0_i32 = arith.constant 0 : i32
    %c0_i32_0 = arith.constant 0 : i32
    return %arg0, %c0_i32 : i32, i32
  }
  func.func @transform_1(%arg0: i32) -> (i32, i32) {
    %c0_i32 = arith.constant 0 : i32
    %c0_i32_0 = arith.constant 0 : i32
    %c0_i32_1 = arith.constant 0 : i32
    return %c0_i32, %c0_i32_0 : i32, i32
  }
  func.func @transform_2(%arg0: i32) -> (i32, i32) {
    %c0_i32 = arith.constant 0 : i32
    %c0_i32_0 = arith.constant 0 : i32
    %c0_i32_1 = arith.constant 0 : i32
    return %c0_i32, %c0_i32_0 : i32, i32
  }
  func.func @transform_3(%arg0: i32) -> (i32, i32) {
    %c0_i32 = arith.constant 0 : i32
    %c0_i32_0 = arith.constant 0 : i32
    return %arg0, %c0_i32 : i32, i32
  }
}

</mosaic_0001>

<bundles_post_ra>
// kernel: tpu_custom_call.1
= control target key start
LH: loop header
LB: loop body
LE: loop exit
PB: predicated region body
PF: predicated region fallthrough
CT: control target
= control target key end

     0   :  { %6 = vsyncpa [#allocation3], 0  ;;  %s481_s0 = inlined_call_operand.hbm [shape: f32[8,128], index: 0, kind: input, shape index: {}]   ;;  %s482_s1 = inlined_call_operand.hbm [shape: f32[16,128], index: 1, kind: output, shape index: {}]  }
   0x1   :  { %7 = vsyncpa [#allocation4], 0 }
   0x2   :  { %9 = vsyncpa [#allocation4 + $0x1], 0  ;;  %s351_s6 = smov 0   ;;  %s353_s7 = smov 0  }
   0x3   :  { %s355_s8 = smov 0   ;;  %s357_s9 = smov 0  }
   0x4 LB: > { %s372_s10 = sadd.s32 4294967295, %s337_s9   ;;  %s183_s11 = sadd.s32 4294967294, %s337_s9   ;;  %s337_s9 = sphi %s357_s9, %s498_s9   ;;  %s333_s8 = sphi %s355_s8, %s497_s8   ;;  %s329_s7 = sphi %s353_s7, %s496_s7   ;;  %s325_s6 = sphi %s351_s6, %s495_s6  }
   0x5   : > { %s376_s12 = sadd.s32 1, %s337_s9   ;;  %s43_s13 = sadd.s32 1, %s333_s8 }
   0x6   : > { %s40_s14 = ssub.s32 %s337_s9, %s376_s12  ;;  %p53_p0 = scmp.ne.s32.totalorder %s333_s8, %s329_s7 }
   0x7   : > { %p41_p1 = scmp.eq.s32.totalorder %s40_s14, 0  ;;  %p54_p2 = scmp.eq.s32.totalorder %s372_s10, 1 }
   0x8   : > { %p59_p3 = scmp.ne.s32.totalorder %s329_s7, %s325_s6  ;;  %p60_p4 = scmp.eq.s32.totalorder %s183_s11, 1 }
   0x9   : > { %s387_s15 = scalar_select %p41_p1, %s333_s8, %s43_s13  }
   0xa   : > { %p389_p5 = por %p54_p2, %p53_p0  ;;  %p393_p6 = por %p60_p4, %p59_p3 }
   0xb   : > { %p184_p7 = scmp.ge.s32.totalorder %s337_s9, 1  ;;  %p67_p8 = scmp.lt.s32.totalorder %s337_s9, 3 }
   0xc   : > { %s486_s16 = scalar_select %p389_p5, 1, 0 }
   0xd   : > { %s487_s17 = scalar_select %p393_p6, 1, 0 }
   0xe   : > { %p483_p9 = scmp.eq.s32.totalorder %s372_s10, 0  ;;  %p400_p10 = pnand %p184_p7, %p67_p8 }
   0xf   : > { %s339_s19 = smov [#allocation2]   ;;  %s243_s24 = scalar_lea.hbm %s481_s0, 128 }
  0x10   : > { %s488_s18 = scalar_select %p400_p10, 1, 0 }
  0x11   : > { %s80_s20 = sshll.u32 %s339_s19, 4  ;;  %p199_p11 = pneg %p400_p10  ;;  %s81_s20 = int_to_ptr.vmem [resolvable:$true] %s80_s20 }
  0x12   : > { %p244_p13 = scmp.ne.s32.totalorder %s481_s0, %s243_s24  ;;  %p250_p3 = scmp.lt.u32.totalorder %s243_s24, %s481_s0 }
  0x13   : > { %p408_p12 = pnand %p483_p9, %p199_p11 }
  0x15   : > { %p245_p0 = pneg %p408_p12 }
  0x17   : > { %p246_p1 = pnand %p245_p0, %p244_p13 }
  0x19   : > { %p247_p2 = pneg %p246_p1 }
  0x1b   : > { %p252_p4 = pnand %p250_p3, %p247_p2 }
  0x1d   : > { %255 = shalt.err (!%p252_p4)
}
  0x1e   : > { %s256_s29 = scalar_lea.vmem %s81_s20, 128  ;;  %p264_p9 = scmp.lt.s32.totalorder %s81_s20, %s81_s20 }
  0x1f   : > { %p257_p7 = scmp.ne.s32.totalorder %s81_s20, %s256_s29  ;;  %p265_p6 = scmp.lt.s32.totalorder %s256_s29, %s256_s29 }
  0x21   : > { %p259_p8 = pnand %p257_p7, %p245_p0  ;;  %p266_p5 = por %p265_p6, %p264_p9 }
  0x23   : > { %p260_p11 = pneg %p259_p8 }
  0x25   : > { %p267_p10 = pnand %p266_p5, %p260_p11 }
  0x27   : > { %270 = shalt.err (!%p267_p10)
}
  0x28   : > { %202 = dma.hbm_to_vmem [thread:$0]  (!%p408_p12), %s481_s0, 128, %s81_s20, [#allocation3]  }
  0x29   : > { %p490_p13 = scmp.ne.s32.totalorder %s488_s18, 0 }
  0x2a   : > { %p491_p1 = scmp.eq.s32.totalorder (!%p490_p13), %s372_s10, 0 }
  0x2b   : > { %93 = sbr.rel (%p490_p13) target bundleno = 77 (0x4d), region = 24 }
  0x32   : > { %316 = dma.done.wait (%p491_p1), [#allocation3], 128   ;;  %p492_p0 = pmov %p491_p1 }
  0x33   : > { %s105_s3 = sand.u32 1, %s329_s7   ;;  %s190_s13 = sshll.u32 %s372_s10, 7  ;;  %v108_v0 = vld [vmem:[#allocation2] sm:$0xff] }
  0x34   : > { %318 = vsyncadd (%p492_p0), [#allocation3], 4294967168  ;;  %s188_s4 = sshll.u32 %s105_s3, 3  ;;  %s441_s18 = scalar_lea.hbm %s482_s1, %s190_s13 }
  0x35   : > { %s107_s5 = scalar_lea.vmem [#allocation5], %s188_s4  ;;  %s111_s20 = scalar_lea.sflag [#allocation4], %s105_s3 }
  0x36   : > { %s124_s11 = sshll.u32 %s107_s5, 4  ;;  %109 = vst [vmem:[%s107_s5] sm:$0xff] %v108_v0  ;;  %p493_p6 = scmp.ne.s32.totalorder %s486_s16, 0  ;;  %s436_s11 = int_to_ptr.vmem [resolvable:$true] %s124_s11 }
  0x37   : > { %s271_s21 = scalar_lea.vmem %s436_s11, 128  ;;  %s340_s22 = smov [#allocation5]  }
  0x38   : > { %p272_p5 = scmp.ne.s32.totalorder %s436_s11, %s271_s21  ;;  %s275_s10 = sshll.u32 %s340_s22, 4  ;;  %s276_s10 = int_to_ptr.vmem [resolvable:$false] %s275_s10 }
  0x39   : > { %s277_s23 = scalar_lea.vmem %s276_s10, 256  ;;  %p278_p12 = scmp.lt.s32.totalorder %s436_s11, %s276_s10 }
  0x3a   : > { %p273_p9 = pnand %p272_p5, %p493_p6  ;;  %p279_p2 = scmp.lt.s32.totalorder %s277_s23, %s271_s21 }
  0x3c   : > { %p274_p10 = pneg %p273_p9  ;;  %p280_p3 = por %p279_p2, %p278_p12 }
  0x3e   : > { %p281_p4 = pnand %p280_p3, %p274_p10 }
  0x40   : > { %284 = shalt.err (!%p281_p4)
}
  0x41   : > { %s285_s24 = scalar_lea.hbm %s441_s18, 128  ;;  %s289_s27 = scalar_lea.hbm %s482_s1, 256 }
  0x42   : > { %p286_p7 = scmp.ne.s32.totalorder %s441_s18, %s285_s24  ;;  %p290_p13 = scmp.lt.u32.totalorder %s441_s18, %s482_s1 }
  0x43   : > { %p291_p1 = scmp.lt.u32.totalorder %s289_s27, %s285_s24  ;;  %p293_p5 = scmp.lt.u32.totalorder %s285_s24, %s441_s18 }
  0x44   : > { %p287_p8 = pnand %p286_p7, %p493_p6 }
  0x45   : > { %p292_p0 = por %p291_p1, %p290_p13 }
  0x46   : > { %p288_p11 = pneg %p287_p8 }
  0x47   : > { %p294_p9 = por %p293_p5, %p292_p0 }
  0x49   : > { %p295_p10 = pnand %p294_p9, %p288_p11 }
  0x4b   : > { %298 = shalt.err (!%p295_p10)
}
  0x4c   : > { %197 = dma.vmem_to_hbm [thread:$0]  (%p493_p6), %s436_s11, 128, %s441_s18, %s111_s20  }
  0x4d PF: > { %p209_p12 = scmp.ge.s32.totalorder %s337_s9, 2  ;;  %s136_s30 = sand.u32 1, %s325_s6  }
  0x4e   : > { %p494_p2 = scmp.ne.s32.totalorder %s487_s17, 0  ;;  %s137_s2 = scalar_lea.sflag [#allocation4], %s136_s30 }
  0x50   : > { %p204_p3 = pnand %p209_p12, %p494_p2 }
  0x52   : > { %320 = dma.done.wait (!%p204_p3), %s137_s2, 128  }
  0x53   : > { %322 = vsyncadd (!%p204_p3), %s137_s2, 4294967168  ;;  %p12_p4 = scmp.ge.s32.totalorder %s376_s12, 4   ;;  %s495_s6 = smov %s329_s7 }
  0x54   : > { %s496_s7 = smov %s333_s8  ;;  %s497_s8 = smov %s387_s15 }
  0x55   : > { %s498_s9 = smov %s376_s12  ;;  %14 = sbr.rel (!%p12_p4) target bundleno = 4 (0x4), region = 61 }
  0x5c   :  { %142 = vsyncpa [#allocation3], 1 }
  0x5d   :  { %144 = vsyncpa [#allocation3 + $0x1], 1 }
  0x5e   :  { %145 = vsyncpa [#allocation4], 1 }
  0x5f   :  { %147 = vsyncpa [#allocation4 + $0x1], 1 }

// kernel: tpu_custom_call.1
= control target key start
LH: loop header
LB: loop body
LE: loop exit
PB: predicated region body
PF: predicated region fallthrough
CT: control target
= control target key end

     0   :  { %vm37_vm0 = vcmask 130048   ;;  %s236_s0 = inlined_call_operand.vmem [shape: f32[32,16], index: 0, kind: input, shape index: {}]   ;;  %s237_s1 = inlined_call_operand.vmem [shape: bf16[16,96], index: 1, kind: input, shape index: {}]   ;;  %s238_s2 = inlined_call_operand.vmem [shape: f32[1,96], index: 2, kind: input, shape index: {}]   ;;  %s239_s3 = inlined_call_operand.hbm [shape: bf16[32,96], index: 3, kind: output, shape index: {}]  }
   0x1   :  { %v154_v0 = vld [vmem:[%s237_s1] sm:$0xff]   ;;  %v17_v2 = vld [vmem:[%s236_s0 + $0x8] sm:$0xff]  ;;  %v18_v3 = vld [vmem:[%s236_s0 + $0x10] sm:$0xff] }
   0x2   :  { %v16_v1 = vld [vmem:[%s236_s0] sm:$0xff]  ;;  %145 = vmatprep.subr.bf16.mxu0 %v154_v0  ;;  %v19_v5 = vld [vmem:[%s236_s0 + $0x18] sm:$0xff] }
   0x3   :  { %v20_v4 = vpack.c.bf16 %v17_v2, %v16_v1 }
   0x4   :  { %8 = vsyncpa [#allocation3], 0  ;;  %146 = vmatpush3.bf16.msra.mxu0 %v154_v0  ;;  %v21_v6 = vpack.c.bf16 %v19_v5, %v18_v3  ;;  %v130_v7 = vld [vmem:[%s238_s2] ss:$0 sm:$0xff]  ;;  %vm109_vm1 = vcmask 781312   ;;  %s179_s23 = smov [#allocation2]  }
   0x5   :  { %147 = vmatprep.mubr.msk.bf16.mxu0 %vm37_vm0, %v20_v4  ;;  %s119_s24 = sshll.u32 %s179_s23, 4  ;;  %s120_s24 = int_to_ptr.vmem [resolvable:$true] %s119_s24 }
   0x6   :  { %s155_s0 = scalar_lea.vmem %s120_s24, 256  ;;  %p160_p1 = scmp.lt.s32.totalorder %s120_s24, %s120_s24 }
   0x7   :  { %148 = vmatmul.mubr.msk.bf16.vlgmr.msra.gmra.mrb[0].mxu0 %vm37_vm0, %v21_v6  ;;  %p156_p0 = scmp.ne.s32.totalorder %s120_s24, %s155_s0  ;;  %p161_p2 = scmp.lt.s32.totalorder %s155_s0, %s155_s0 }
   0x9   :  { %p162_p3 = por %p161_p2, %p160_p1 }
   0xb   :  { %p163_p4 = pnand %p162_p3, %p156_p0 }
  0xda   :  { %v149_v8 = vpop.f32.mrb[0].mxu0 }
  0xdb   :  { %v87_v9 = vadd.f32 %v149_v8, %v130_v7  ;;  %v78_v10 = vpop.f32.mrb[1].mxu0 }
  0xdc   :  { %v79_v11 = vadd.f32 %v130_v7, %v78_v10  ;;  %v150_v12 = vpop.f32.mrb[2].mxu0 }
  0xdd   :  { %v140_v13 = vpack.c.bf16 %v87_v9, %v87_v9  ;;  %v90_v14 = vadd.f32 %v150_v12, %v130_v7  ;;  %v81_v15 = vpop.f32.mrb[3].mxu0 }
  0xde   :  { %v138_v16 = vpack.c.bf16 %v79_v11, %v79_v11  ;;  %v82_v17 = vadd.f32 %v130_v7, %v81_v15 }
  0xdf   :  { %112 = vst.msk [vmem:[#allocation2 + $0x8] sm:$0xf] %vm109_vm1, %v140_v13  ;;  %v141_v18 = vpack.c.bf16 %v90_v14, %v90_v14 }
  0xe0   :  { %110 = vst.msk [vmem:[#allocation2] sm:$0xf] %vm109_vm1, %v138_v16  ;;  %v139_v19 = vpack.c.bf16 %v82_v17, %v82_v17 }
  0xe1   :  { %113 = vst.msk [vmem:[#allocation2 + $0xc] sm:$0xf] %vm109_vm1, %v141_v18 }
  0xe2   :  { %111 = vst.msk [vmem:[#allocation2 + $0x4] sm:$0xf] %vm109_vm1, %v139_v19 }
  0xe3   :  { %166 = shalt.err (!%p163_p4)
}
  0xe4   :  { %s167_s26 = scalar_lea.hbm %s239_s3, 256 }
  0xe5   :  { %p168_p5 = scmp.ne.s32.totalorder %s239_s3, %s167_s26  ;;  %p171_p6 = scmp.lt.u32.totalorder %s167_s26, %s239_s3 }
  0xe7   :  { %p173_p7 = pnand %p171_p6, %p168_p5 }
  0xe9   :  { %176 = shalt.err (!%p173_p7)
}
  0xea   :  { %s180_s4 = smov 64   ;;  %s181_s5 = smov 4  }
  0xeb   :  { %125 = dma.vmem_to_hbm [thread:$0]  %s120_s24, 256, %s239_s3, [#allocation3], %s180_s4, %s180_s4, %s181_s5  }
  0xec   :  { %177 = dma.done.wait [#allocation3], 256  }
  0xed   :  { %178 = vsyncadd [#allocation3], 4294967040 }
  0xee   :  { %129 = vsyncpa [#allocation3], 1 }

</bundles_post_ra>
